<compile_context>
chip_gen: v7x
topology: tpu7x:2x2x1
jax: 0.10.0
libtpu: 0.0.40
codegen_flags: <defaults>
</compile_context>

<pallas_src>
import math
from functools import partial

import jax
import jax.numpy as jnp
from jax.experimental import pallas as pl
from jax.experimental.pallas import tpu as pltpu


def _round_up(a, b):
    return (a + b - 1) // b * b


def _num_tensorcores():
    # v7x has 2 TensorCores per chip; the "parallel" M axis only feeds both if
    # there are >= 2 M tiles. Heuristic on device_kind; default 1 (safe).
    try:
        kind = (jax.devices()[0].device_kind or "").lower()
        if "v7" in kind:
            return 2
    except Exception:
        pass
    return 1


def _vmem_budget_bytes():
    # Generation-aware scoped-VMEM budget: 7/8 of physical VMEM (~56 MiB on
    # v7x, ~112 MiB on v5e/v6e), leaving headroom for compiler scratch.
    try:
        cap = int(pltpu.get_tpu_info().vmem_capacity_bytes)
    except Exception:
        cap = 64 << 20
    return (cap * 7) // 8


def _footprint_bytes(block_m, block_h, C):
    # Per-step VMEM need with double-buffered pipelined tiles. No separate f32
    # accumulator scratch: the f32 output tile doubles as the accumulator.
    return (
        2 * block_m * C * 4        # x tiles (f32, 2 buffers)
        + 2 * block_m * C * 4      # out tiles (f32, 2 buffers; acc lives here)
        + 2 * C * block_h * 2      # W1 tiles (bf16, 2 buffers)
        + 2 * block_h * C * 2      # W2 tiles (bf16, 2 buffers)
        + 2 * (block_h + C) * 4    # bias tiles
        + block_m * C * 2          # in-kernel bf16 cast of x
        + block_m * block_h * 6    # hidden activations (f32 + bf16 copy)
    )


def _mlp_kernel(x_ref, w1_ref, b1_ref, w2_ref, b2_ref, o_ref):
    # x_ref:  (block_m, C)     f32   (cast to bf16 in-kernel)
    # w1_ref: (C, block_h)     bf16
    # b1_ref: (1, block_h)     f32
    # w2_ref: (block_h, C)     bf16
    # b2_ref: (1, C)           f32
    # o_ref:  (block_m, C)     f32   -- VMEM-resident accumulator over the
    #                                   hidden (reduction) grid axis j.
    j = pl.program_id(1)

    @pl.when(j == 0)
    def _():
        o_ref[...] = jnp.zeros_like(o_ref)

    x_bf = x_ref[...].astype(jnp.bfloat16)
    # layer1 slice over this hidden tile: (block_m, block_h), f32 accumulate.
    h = jnp.dot(x_bf, w1_ref[...], preferred_element_type=jnp.float32)
    h = h + b1_ref[...]
    # Exact GELU (erf form), matching torch.nn.GELU() default. Elementwise in
    # the hidden dim, so applying it per hidden tile is exact.
    h = 0.5 * h * (1.0 + jax.lax.erf(h * (1.0 / math.sqrt(2.0))))

    # layer2 partial contribution of this hidden tile (bf16 MXU, f32 acc).
    o_ref[...] += jnp.dot(
        h.astype(jnp.bfloat16), w2_ref[...], preferred_element_type=jnp.float32
    )

    @pl.when(j == pl.num_programs(1) - 1)
    def _():
        # TODO(synk): dropout is identity (eval mode / p=0); training-mode
        # dropout would need pltpu.prng_seed + prng_random_bits masking here.
        o_ref[...] += b2_ref[...]


@partial(jax.jit, static_argnames=("block_m", "block_h"))
def mlp_forward(x, w1_t, b1, w2_t, b2, block_m=512, block_h=512):
    """x: (B, T, C) float32. w1_t: (C, H) bf16, b1: (1, H), w2_t: (H, C) bf16,
    b2: (1, C). Returns (B, T, C) float32."""
    B, T, C = x.shape
    H = w1_t.shape[1]
    M = B * T

    # --- hidden-dim tiling: largest multiple-of-128 divisor of H_pad that is
    # <= the requested block_h (H zero-padded to a 128 multiple if needed).
    H_pad = _round_up(H, 128)
    h_cands = sorted(
        (d for d in range(128, H_pad + 1, 128) if H_pad % d == 0), reverse=True
    )
    block_h = next((d for d in h_cands if d <= block_h), h_cands[-1])

    # --- M tiling: 16-aligned (bf16 row packing), clamped for tiny M; on
    # 2-TensorCore chips keep >= 2 M tiles so both cores get work.
    block_m = max(16, min(block_m, _round_up(M, 16)))
    block_m = _round_up(block_m, 16)
    if _num_tensorcores() >= 2 and M > 32:
        half = _round_up(-(-M // 2), 256 if M >= 512 else 16)
        block_m = min(block_m, max(16, half))

    # --- derive tiles from the VMEM budget (not the budget from the tiles).
    budget = _vmem_budget_bytes()
    for cand in (d for d in h_cands if d <= block_h):
        block_h = cand
        if _footprint_bytes(block_m, block_h, C) <= budget:
            break
    while _footprint_bytes(block_m, block_h, C) > budget and block_m > 16:
        block_m = max(16, _round_up(block_m // 2, 16))

    M_pad = _round_up(M, block_m)
    num_m = M_pad // block_m
    num_h = H_pad // block_h

    # --- dtype / padding plumbing. x stays f32 (bf16 cast happens in-kernel,
    # no extra HBM pass); weights are expected pre-stored in bf16 and are only
    # cast here if the caller did not do so.
    x2d = x.reshape(M, C)
    if M_pad != M:
        x2d = jnp.pad(x2d, ((0, M_pad - M), (0, 0)))
    if w1_t.dtype != jnp.bfloat16:
        w1_t = w1_t.astype(jnp.bfloat16)
    if w2_t.dtype != jnp.bfloat16:
        w2_t = w2_t.astype(jnp.bfloat16)
    b1 = b1.reshape(1, H).astype(jnp.float32)
    b2 = b2.reshape(1, C).astype(jnp.float32)
    if H_pad != H:
        # Zero-padding the hidden dim is exact: GELU(0 + 0) = 0 contributes 0.
        w1_t = jnp.pad(w1_t, ((0, 0), (0, H_pad - H)))
        b1 = jnp.pad(b1, ((0, 0), (0, H_pad - H)))
        w2_t = jnp.pad(w2_t, ((0, H_pad - H), (0, 0)))

    footprint = _footprint_bytes(block_m, block_h, C)
    vmem_limit = int(min(budget, max(footprint + (4 << 20), 32 << 20)))

    cost = pl.CostEstimate(
        flops=int(4 * M_pad * C * H_pad),            # two matmuls: 2*M*C*H each
        transcendentals=int(M_pad * H_pad),          # erf per hidden activation
        bytes_accessed=int(
            M_pad * C * 4                            # x read (f32)
            + M_pad * C * 4                          # out write (f32)
            + num_m * 2 * C * H_pad * 2              # W1+W2 re-read per M tile
            + (H_pad + C) * 4                        # biases
        ),
    )

    out2d = pl.pallas_call(
        _mlp_kernel,
        out_shape=jax.ShapeDtypeStruct((M_pad, C), jnp.float32),
        grid_spec=pltpu.PrefetchScalarGridSpec(
            num_scalar_prefetch=0,
            grid=(num_m, num_h),
            in_specs=[
                pl.BlockSpec((block_m, C), lambda i, j: (i, 0)),   # x tile
                pl.BlockSpec((C, block_h), lambda i, j: (0, j)),   # W1^T tile
                pl.BlockSpec((1, block_h), lambda i, j: (0, j)),   # b1 tile
                pl.BlockSpec((block_h, C), lambda i, j: (j, 0)),   # W2^T tile
                pl.BlockSpec((1, C), lambda i, j: (0, 0)),         # b2 (resident)
            ],
            out_specs=pl.BlockSpec((block_m, C), lambda i, j: (i, 0)),
        ),
        compiler_params=pltpu.CompilerParams(
            dimension_semantics=("parallel", "arbitrary"),
            vmem_limit_bytes=vmem_limit,
        ),
        cost_estimate=cost,
    )(x2d, w1_t, b1, w2_t, b2)

    return out2d[:M].reshape(B, T, C)


def mlp_reference(x, w1_t, b1, w2_t, b2):
    """Pure f32 reference matching the PyTorch module (eval mode)."""
    h = x @ w1_t + b1
    h = 0.5 * h * (1.0 + jax.lax.erf(h / jnp.sqrt(2.0).astype(h.dtype)))
    return h @ w2_t + b2


if __name__ == "__main__":
    # Module config: n_embd=32, mlp_mult=4, dropout=0.0 (eval), bias=True
    n_embd = 32
    mlp_mult = 4
    hidden = mlp_mult * n_embd  # 128
    B, T = 2, 8

    key = jax.random.PRNGKey(0)
    kx, k1, kb1, k2, kb2 = jax.random.split(key, 5)

    x = jax.random.normal(kx, (B, T, n_embd), dtype=jnp.float32)

    # PyTorch Linear-style init; weights stored pre-transposed as (in, out).
    # bf16 weight copies are created ONCE here (parameter creation), not per
    # call in the wrapper.
    bound1 = 1.0 / math.sqrt(n_embd)
    w1_f32 = jax.random.uniform(k1, (n_embd, hidden), jnp.float32, -bound1, bound1)
    b1 = jax.random.uniform(kb1, (1, hidden), jnp.float32, -bound1, bound1)
    bound2 = 1.0 / math.sqrt(hidden)
    w2_f32 = jax.random.uniform(k2, (hidden, n_embd), jnp.float32, -bound2, bound2)
    b2 = jax.random.uniform(kb2, (1, n_embd), jnp.float32, -bound2, bound2)

    w1_bf = w1_f32.astype(jnp.bfloat16)
    w2_bf = w2_f32.astype(jnp.bfloat16)

    out = mlp_forward(x, w1_bf, b1, w2_bf, b2)
    out = jax.block_until_ready(out)

    # Reference uses the same bf16-quantized weights (upcast) so the remaining
    # error is only from in-kernel bf16 activation casts with f32 accumulate.
    ref = mlp_reference(
        x.reshape(B * T, n_embd),
        w1_bf.astype(jnp.float32), b1,
        w2_bf.astype(jnp.float32), b2,
    ).reshape(B, T, n_embd)

    assert out.shape == (B, T, n_embd)
    assert jnp.allclose(out, ref, atol=2e-2, rtol=2e-2), "mismatch vs reference"

    print("KERNEL_OK")
</pallas_src>

<mosaic_0001>
module attributes {stable_mosaic.version = 11 : i64} {
  func.func @_mlp_kernel(%arg0: i32, %arg1: i32, %arg2: memref<16x32xf32, #tpu.memory_space<vmem>>, %arg3: memref<32x128xbf16, #tpu.memory_space<vmem>>, %arg4: memref<1x128xf32, #tpu.memory_space<vmem>>, %arg5: memref<128x32xbf16, #tpu.memory_space<vmem>>, %arg6: memref<1x32xf32, #tpu.memory_space<vmem>>, %arg7: memref<16x32xf32, #tpu.memory_space<vmem>>) attributes {dimension_semantics = [#tpu.dimension_semantics<parallel>, #tpu.dimension_semantics<arbitrary>], iteration_bounds = array<i64: 1, 1>, scalar_prefetch = 0 : i64, scratch_operands = 0 : i64, tpu.core_type = #tpu.core_type<tc>, window_params = [{transform_indices = @transform_0, window_bounds = array<i64: 16, 32>}, {transform_indices = @transform_1, window_bounds = array<i64: 32, 128>}, {transform_indices = @transform_2, window_bounds = array<i64: 1, 128>}, {transform_indices = @transform_3, window_bounds = array<i64: 128, 32>}, {pipeline_mode = #tpu.pipeline_mode<synchronous>, transform_indices = @transform_4, window_bounds = array<i64: 1, 32>}, {transform_indices = @transform_5, window_bounds = array<i64: 16, 32>}]} {
    %c0_i32 = arith.constant 0 : i32
    %0 = arith.cmpi eq, %arg1, %c0_i32 : i32
    %1 = arith.extui %0 : i1 to i32
    %c0_i32_0 = arith.constant 0 : i32
    %2 = arith.cmpi ne, %1, %c0_i32_0 : i32
    scf.if %2 {
      %cst_18 = arith.constant 0.000000e+00 : f32
      %27 = vector.broadcast %cst_18 : f32 to vector<16x32xf32>
      %c0_19 = arith.constant 0 : index
      %c0_20 = arith.constant 0 : index
      %28 = vector.load %arg7[%c0_19, %c0_20] : memref<16x32xf32, #tpu.memory_space<vmem>>, vector<16x32xf32>
      tpu.vector_store %arg7[%c0_19, %c0_20], %27 {strides = array<i32>} : memref<16x32xf32, #tpu.memory_space<vmem>>, vector<16x32xf32>,
    } else {
    }
    %c0 = arith.constant 0 : index
    %c0_1 = arith.constant 0 : index
    %3 = vector.load %arg2[%c0, %c0_1] : memref<16x32xf32, #tpu.memory_space<vmem>>, vector<16x32xf32>
    %4 = arith.truncf %3 : vector<16x32xf32> to vector<16x32xbf16>
    %c0_2 = arith.constant 0 : index
    %c0_3 = arith.constant 0 : index
    %5 = vector.load %arg3[%c0_2, %c0_3] : memref<32x128xbf16, #tpu.memory_space<vmem>>, vector<32x128xbf16>
    %cst = arith.constant dense<0.000000e+00> : vector<16x128xf32>
    %6 = tpu.matmul %4, %5, %cst {dimension_numbers = #tpu.dot_dimension_numbers<[1], [0], [0], [1], [0, 0, 1, 1], [], []>} : vector<16x32xbf16>, vector<32x128xbf16>, vector<16x128xf32> -> vector<16x128xf32>
    %c0_4 = arith.constant 0 : index
    %c0_5 = arith.constant 0 : index
    %7 = vector.load %arg4[%c0_4, %c0_5] : memref<1x128xf32, #tpu.memory_space<vmem>>, vector<1x128xf32>
    %8 = vector.broadcast %7 : vector<1x128xf32> to vector<16x128xf32>
    %9 = arith.addf %6, %8 : vector<16x128xf32>
    %cst_6 = arith.constant 5.000000e-01 : f32
    %10 = vector.broadcast %cst_6 : f32 to vector<16x128xf32>
    %11 = arith.mulf %10, %9 : vector<16x128xf32>
    %cst_7 = arith.constant 0.707106769 : f32
    %12 = vector.broadcast %cst_7 : f32 to vector<16x128xf32>
    %13 = arith.mulf %9, %12 : vector<16x128xf32>
    %14 = math.erf %13 : vector<16x128xf32>
    %cst_8 = arith.constant 1.000000e+00 : f32
    %15 = vector.broadcast %cst_8 : f32 to vector<16x128xf32>
    %16 = arith.addf %15, %14 : vector<16x128xf32>
    %17 = arith.mulf %11, %16 : vector<16x128xf32>
    %c0_9 = arith.constant 0 : index
    %c0_10 = arith.constant 0 : index
    %18 = vector.load %arg7[%c0_9, %c0_10] : memref<16x32xf32, #tpu.memory_space<vmem>>, vector<16x32xf32>
    %19 = arith.truncf %17 : vector<16x128xf32> to vector<16x128xbf16>
    %c0_11 = arith.constant 0 : index
    %c0_12 = arith.constant 0 : index
    %20 = vector.load %arg5[%c0_11, %c0_12] : memref<128x32xbf16, #tpu.memory_space<vmem>>, vector<128x32xbf16>
    %cst_13 = arith.constant dense<0.000000e+00> : vector<16x32xf32>
    %21 = tpu.matmul %19, %20, %cst_13 {dimension_numbers = #tpu.dot_dimension_numbers<[1], [0], [0], [1], [0, 0, 1, 1], [], []>} : vector<16x128xbf16>, vector<128x32xbf16>, vector<16x32xf32> -> vector<16x32xf32>
    %22 = arith.addf %18, %21 : vector<16x32xf32>
    %c0_14 = arith.constant 0 : index
    %c0_15 = arith.constant 0 : index
    %23 = vector.load %arg7[%c0_14, %c0_15] : memref<16x32xf32, #tpu.memory_space<vmem>>, vector<16x32xf32>
    tpu.vector_store %arg7[%c0_14, %c0_15], %22 {strides = array<i32>} : memref<16x32xf32, #tpu.memory_space<vmem>>, vector<16x32xf32>,
    %c0_i32_16 = arith.constant 0 : i32
    %24 = arith.cmpi eq, %arg1, %c0_i32_16 : i32
    %25 = arith.extui %24 : i1 to i32
    %c0_i32_17 = arith.constant 0 : i32
    %26 = arith.cmpi ne, %25, %c0_i32_17 : i32
    scf.if %26 {
      %c0_18 = arith.constant 0 : index
      %c0_19 = arith.constant 0 : index
      %27 = vector.load %arg7[%c0_18, %c0_19] : memref<16x32xf32, #tpu.memory_space<vmem>>, vector<16x32xf32>
      %c0_20 = arith.constant 0 : index
      %c0_21 = arith.constant 0 : index
      %28 = vector.load %arg6[%c0_20, %c0_21] : memref<1x32xf32, #tpu.memory_space<vmem>>, vector<1x32xf32>
      %29 = vector.broadcast %28 : vector<1x32xf32> to vector<16x32xf32>
      %30 = arith.addf %27, %29 : vector<16x32xf32>
      %c0_22 = arith.constant 0 : index
      %c0_23 = arith.constant 0 : index
      %31 = vector.load %arg7[%c0_22, %c0_23] : memref<16x32xf32, #tpu.memory_space<vmem>>, vector<16x32xf32>
      tpu.vector_store %arg7[%c0_22, %c0_23], %30 {strides = array<i32>} : memref<16x32xf32, #tpu.memory_space<vmem>>, vector<16x32xf32>,
    } else {
    }
    return
  }
  func.func @transform_0(%arg0: i32, %arg1: i32) -> (i32, i32) {
    %c0_i32 = arith.constant 0 : i32
    %c0_i32_0 = arith.constant 0 : i32
    return %arg0, %c0_i32 : i32, i32
  }
  func.func @transform_1(%arg0: i32, %arg1: i32) -> (i32, i32) {
    %c0_i32 = arith.constant 0 : i32
    %c0_i32_0 = arith.constant 0 : i32
    return %c0_i32, %arg1 : i32, i32
  }
  func.func @transform_2(%arg0: i32, %arg1: i32) -> (i32, i32) {
    %c0_i32 = arith.constant 0 : i32
    %c0_i32_0 = arith.constant 0 : i32
    return %c0_i32, %arg1 : i32, i32
  }
  func.func @transform_3(%arg0: i32, %arg1: i32) -> (i32, i32) {
    %c0_i32 = arith.constant 0 : i32
    %c0_i32_0 = arith.constant 0 : i32
    return %arg1, %c0_i32 : i32, i32
  }
  func.func @transform_4(%arg0: i32, %arg1: i32) -> (i32, i32) {
    %c0_i32 = arith.constant 0 : i32
    %c0_i32_0 = arith.constant 0 : i32
    %c0_i32_1 = arith.constant 0 : i32
    return %c0_i32, %c0_i32_0 : i32, i32
  }
  func.func @transform_5(%arg0: i32, %arg1: i32) -> (i32, i32) {
    %c0_i32 = arith.constant 0 : i32
    %c0_i32_0 = arith.constant 0 : i32
    return %arg0, %c0_i32 : i32, i32
  }
}

</mosaic_0001>

<bundles_post_ra>
// kernel: mlp_forward.1
= control target key start
LH: loop header
LB: loop body
LE: loop exit
PB: predicated region body
PF: predicated region fallthrough
CT: control target
= control target key end

     0   :  { %v350_v1 = vmov 0.0   ;;  %vm351_vm0 = vmmov 0   ;;  %vm26_vm1 = vcmask 261120   ;;  %s446_s0 = inlined_call_operand.vmem [shape: f32[16,32], index: 0, kind: input, shape index: {}]   ;;  %s447_s1 = inlined_call_operand.vmem [shape: bf16[32,128], index: 1, kind: input, shape index: {}]   ;;  %s448_s2 = inlined_call_operand.vmem [shape: f32[1,128], index: 2, kind: input, shape index: {}]   ;;  %s449_s3 = inlined_call_operand.vmem [shape: bf16[128,32], index: 3, kind: input, shape index: {}]   ;;  %s450_s4 = inlined_call_operand.vmem [shape: f32[1,32], index: 4, kind: input, shape index: {}]   ;;  %s451_s5 = inlined_call_operand.hbm [shape: f32[16,32], index: 5, kind: output, shape index: {}]  }
   0x1   :  { %v312_v0 = vld [vmem:[%s447_s1] sm:$0xff]   ;;  %279 = vmatprep.subr.bf16.mxu0 %v350_v1  ;;  %v313_v2 = vld [vmem:[%s447_s1 + $0x8] sm:$0xff]   ;;  %287 = vmatprep.subr.bf16.mxu1 %v350_v1  ;;  %27 = vst.msk [vmem:[#allocation2] sm:$0xff] %vm26_vm1, %v350_v1  ;;  %28 = vst.msk [vmem:[#allocation2 + $0x8] sm:$0xff] %vm26_vm1, %v350_v1 }
   0x2   :  { %280 = vmatpush3.bf16.msra.mxu0 %v312_v0  ;;  %283 = vmatprep.mubr.msk.bf16.mxu0 %vm351_vm0, %v350_v1  ;;  %v29_v3 = vld [vmem:[%s446_s0] sm:$0xff]  ;;  %v30_v4 = vld [vmem:[%s446_s0 + $0x8] sm:$0xff] }
   0x3   :  { %281 = vmatprep.subr.bf16.mxu0 %v350_v1  ;;  %v314_v5 = vld [vmem:[%s449_s3] sm:$0xff]   ;;  %303 = vmatprep.mubr.msk.bf16.mxu1 %vm351_vm0, %v350_v1  ;;  %v315_v6 = vld [vmem:[%s449_s3 + $0x8] sm:$0xff]   ;;  %v31_v7 = vpack.c.bf16 %v30_v4, %v29_v3 }
   0x4   :  { %288 = vmatpush3.bf16.msra.mxu1 %v314_v5 }
   0x5   :  { %289 = vmatprep.subr.bf16.mxu1 %v350_v1 }
   0x6   :  { %282 = vmatpush3.bf16.msra.mxu0 %v313_v2 }
   0x8   :  { %290 = vmatpush3.bf16.msra.mxu1 %v315_v6 }
   0x9   :  { %284 = vmatmul.mubr.msk.bf16.vlgmr.msra.gmra.mrb[0].mxu0 %vm26_vm1, %v31_v7 }
   0xa   :  { %10 = vsyncpa [#allocation3], 0  ;;  %291 = vmatprep.subr.bf16.mxu1 %v350_v1  ;;  %v316_v8 = vld [vmem:[%s449_s3 + $0x10] sm:$0xff]   ;;  %v317_v9 = vld [vmem:[%s449_s3 + $0x18] sm:$0xff]   ;;  %s352_s17 = smov [#allocation2]  }
   0xb   :  { %v318_v10 = vld [vmem:[%s449_s3 + $0x20] sm:$0xff]   ;;  %v319_v11 = vld [vmem:[%s449_s3 + $0x28] sm:$0xff]   ;;  %v320_v12 = vld [vmem:[%s449_s3 + $0x30] sm:$0xff]   ;;  %s243_s18 = sshll.u32 %s352_s17, 4  ;;  %s244_s18 = int_to_ptr.vmem [resolvable:$true] %s243_s18 }
   0xc   :  { %292 = vmatpush3.bf16.msra.mxu1 %v316_v8  ;;  %v321_v13 = vld [vmem:[%s449_s3 + $0x38] sm:$0xff]   ;;  %v254_v14 = vld [vmem:[%s448_s2] ss:$0 sm:$0xff]  ;;  %v111_v34 = vld [vmem:[#allocation2 + $0x8] sm:$0xff]  ;;  %s326_s19 = scalar_lea.vmem %s244_s18, 256  ;;  %p331_p1 = scmp.lt.s32.totalorder %s244_s18, %s244_s18 }
   0xd   :  { %293 = vmatprep.subr.bf16.mxu1 %v350_v1  ;;  %v110_v32 = vld [vmem:[#allocation2] sm:$0xff]  ;;  %p327_p0 = scmp.ne.s32.totalorder %s244_s18, %s326_s19  ;;  %p332_p2 = scmp.lt.s32.totalorder %s326_s19, %s326_s19 }
   0xe   :  { %v266_v40 = vld [vmem:[%s450_s4] ss:$0 sm:$0xff] }
   0xf   :  { %p333_p3 = por %p332_p2, %p331_p1 }
  0x10   :  { %294 = vmatpush3.bf16.msra.mxu1 %v317_v9 }
  0x11   :  { %295 = vmatprep.subr.bf16.mxu1 %v350_v1  ;;  %p334_p4 = pnand %p333_p3, %p327_p0 }
  0x14   :  { %296 = vmatpush3.bf16.msra.mxu1 %v318_v10 }
  0x15   :  { %297 = vmatprep.subr.bf16.mxu1 %v350_v1 }
  0x18   :  { %298 = vmatpush3.bf16.msra.mxu1 %v319_v11 }
  0x19   :  { %299 = vmatprep.subr.bf16.mxu1 %v350_v1 }
  0x1c   :  { %300 = vmatpush3.bf16.msra.mxu1 %v320_v12 }
  0x1d   :  { %301 = vmatprep.subr.bf16.mxu1 %v350_v1 }
  0x20   :  { %302 = vmatpush3.bf16.msra.mxu1 %v321_v13 }
  0xdc   :  { %v93_v15 = vpop.f32.mrb[0].mxu0 }
  0xdd   :  { %v94_v16 = vadd.f32 %v254_v14, %v93_v15  ;;  %v285_v17 = vpop.f32.mrb[1].mxu0 }
  0xde   :  { %v96_v18 = vpop.f32.mrb[2].mxu0 }
  0xdf   :  { %v102_v19 = vmul.f32 0.70710677, %v94_v16  ;;  %v97_v20 = vadd.f32 %v254_v14, %v96_v18  ;;  %v286_v21 = vpop.f32.mrb[3].mxu0  ;;  %v100_v26 = vmul.f32 0.5, %v94_v16 }
  0xe1   :  { %322 = verf.f32 %v102_v19  ;;  %v103_v22 = vmul.f32 0.70710677, %v97_v20  ;;  %v101_v27 = vmul.f32 0.5, %v97_v20 }
  0xe3   :  { %324 = verf.f32 %v103_v22 }
  0xeb   :  { %v323_v23 = vpop.eup %322 }
  0xec   :  { %v106_v24 = vadd.f32 1.0, %v323_v23 }
  0xed   :  { %v325_v25 = vpop.eup %324 }
  0xee   :  { %v107_v28 = vadd.f32 1.0, %v325_v25  ;;  %v108_v29 = vmul.f32 %v106_v24, %v100_v26 }
  0xf0   :  { %v109_v30 = vmul.f32 %v107_v28, %v101_v27 }
  0xf2   :  { %v112_v31 = vpack.c.bf16 %v109_v30, %v108_v29 }
  0xf4   :  { %304 = vmatmul.mubr.bf16.vlgmr.msra.gmra.mrb[0].mxu1 %v112_v31 }
 0x1c7   :  { %v211_v33 = vpop.f32.mrb[0].mxu1 }
 0x1c8   :  { %v218_v35 = vadd.f32 %v211_v33, %v110_v32  ;;  %v305_v36 = vpop.f32.mrb[1].mxu1 }
 0x1c9   :  { %v214_v37 = vpop.f32.mrb[2].mxu1 }
 0x1ca   :  { %220 = vst.msk [vmem:[#allocation2] sm:$0xff] %vm26_vm1, %v218_v35  ;;  %v219_v38 = vadd.f32 %v214_v37, %v111_v34  ;;  %v306_v39 = vpop.f32.mrb[3].mxu1 }
 0x1cc   :  { %221 = vst.msk [vmem:[#allocation2 + $0x8] sm:$0xff] %vm26_vm1, %v219_v38 }
 0x1d1   :  { %v225_v41 = vld [vmem:[#allocation2] sm:$0xff] }
 0x1d2   :  { %v234_v42 = vadd.f32 %v266_v40, %v225_v41 }
 0x1d3   :  { %v226_v43 = vld [vmem:[#allocation2 + $0x8] sm:$0xff] }
 0x1d4   :  { %v235_v44 = vadd.f32 %v266_v40, %v226_v43  ;;  %236 = vst.msk [vmem:[#allocation2] sm:$0xff] %vm26_vm1, %v234_v42 }
 0x1d6   :  { %237 = vst.msk [vmem:[#allocation2 + $0x8] sm:$0xff] %vm26_vm1, %v235_v44 }
 0x1d7   :  { %337 = shalt.err (!%p334_p4)
}
 0x1d8   :  { %s338_s21 = scalar_lea.hbm %s451_s5, 256 }
 0x1d9   :  { %p339_p5 = scmp.ne.s32.totalorder %s451_s5, %s338_s21  ;;  %p342_p6 = scmp.lt.u32.totalorder %s338_s21, %s451_s5 }
 0x1db   :  { %p344_p7 = pnand %p342_p6, %p339_p5 }
 0x1dd   :  { %347 = shalt.err (!%p344_p7)
}
 0x1de   :  { %s353_s26 = smov 128   ;;  %s354_s1 = smov 8  }
 0x1df   :  { %249 = dma.vmem_to_hbm [thread:$0]  %s244_s18, 256, %s451_s5, [#allocation3], %s353_s26, %s353_s26, %s354_s1  }
 0x1e0   :  { %348 = dma.done.wait [#allocation3], 256  }
 0x1e1   :  { %349 = vsyncadd [#allocation3], 4294967040 }
 0x1e2   :  { %253 = vsyncpa [#allocation3], 1 }

</bundles_post_ra>
